<compile_context>
chip_gen: v5e
topology: v5e:2x2
jax: 0.10.0
libtpu: 0.0.40
codegen_flags: <defaults>
</compile_context>

<pallas_src>
import functools

import jax
import jax.numpy as jnp
from jax import lax
from jax.experimental import pallas as pl
from jax.experimental.pallas import tpu as pltpu

# Tunables (per perf review: larger tiles, 256-multiples on the MXU-facing dims).
FEAT_ROW_TILE_MAX = 512        # rows per features-MLP grid step
Q_TILE_MAX = 256               # query rows per attend grid step
DB_TILE_MAX = 512              # db rows streamed per reduction step
_VMEM_LIMIT_BYTES = 48 * 1024 * 1024
_MASK_VALUE = -1e30


def _round_up(x, m):
    return ((x + m - 1) // m) * m


def _pad_rows_to(a, rows, value=0.0):
    n = a.shape[0]
    if n == rows:
        return a
    if n > rows:
        return a[:rows]
    widths = ((0, rows - n),) + ((0, 0),) * (a.ndim - 1)
    return jnp.pad(a, widths, constant_values=value)


# ----------------------------- features (MLP) ------------------------------ #
def _features_kernel(x_ref, w1_ref, b1_ref, w2_ref, b2_ref, o_ref):
    # bf16 operands on the MXU, f32 accumulation; bf16 storage halves the
    # db feature stream that attend_kde re-reads once per query tile.
    x = x_ref[...].astype(jnp.bfloat16)
    h = jnp.dot(x, w1_ref[...], preferred_element_type=jnp.float32)
    h = jnp.maximum(h + b1_ref[...], 0.0)
    o = jnp.dot(h.astype(jnp.bfloat16), w2_ref[...],
                preferred_element_type=jnp.float32) + b2_ref[...]
    o_ref[...] = o.astype(o_ref.dtype)


def features_forward(x, params, *, max_row_tile=FEAT_ROW_TILE_MAX):
    """MLP features.  Returns bf16 features, padded up to the row tile."""
    w1, b1, w2, b2 = params
    n, d_in = x.shape
    d_hid, d_out = w1.shape[1], w2.shape[1]
    row_tile = max_row_tile if n >= max_row_tile else max(8, _round_up(n, 8))
    xp = _pad_rows_to(x, _round_up(n, row_tile))
    n_pad = xp.shape[0]
    # TODO(synk): for production-sized layers on v7x (64 MiB VMEM) the resident
    # weight specs should also use pipeline_mode=pl.Buffered(1) to avoid
    # double-buffering the weights; at these shapes it is irrelevant.
    return pl.pallas_call(
        _features_kernel,
        out_shape=jax.ShapeDtypeStruct((n_pad, d_out), jnp.bfloat16),
        grid_spec=pltpu.PrefetchScalarGridSpec(
            num_scalar_prefetch=0,
            grid=(n_pad // row_tile,),
            in_specs=[
                pl.BlockSpec((row_tile, d_in), lambda i: (i, 0)),
                pl.BlockSpec((d_in, d_hid), lambda i: (0, 0)),    # resident
                pl.BlockSpec((1, d_hid), lambda i: (0, 0)),       # resident
                pl.BlockSpec((d_hid, d_out), lambda i: (0, 0)),   # resident
                pl.BlockSpec((1, d_out), lambda i: (0, 0)),       # resident
            ],
            out_specs=pl.BlockSpec((row_tile, d_out), lambda i: (i, 0)),
        ),
        compiler_params=pltpu.CompilerParams(
            dimension_semantics=("parallel",),
            vmem_limit_bytes=_VMEM_LIMIT_BYTES),
    )(xp, w1.astype(jnp.bfloat16), b1, w2.astype(jnp.bfloat16), b2)


# ---------------- fused Descriptors2Weights + KDE (online softmax) ---------- #
def _attend_kernel(*args, inv_m, dist_type):
    if dist_type == "l2":
        (q_ref, x_ref, xn_ref, mask_ref, c_ref,
         acc_out, m_out, l_out, m_sc, l_sc, acc_sc) = args
    else:
        (q_ref, x_ref, mask_ref, c_ref,
         acc_out, m_out, l_out, m_sc, l_sc, acc_sc) = args

    k = pl.program_id(2)

    @pl.when(k == 0)
    def _():
        m_sc[...] = jnp.full_like(m_sc, -jnp.inf)
        l_sc[...] = jnp.zeros_like(l_sc)
        acc_sc[...] = jnp.zeros_like(acc_sc)

    # Similarity on the MXU: bf16 features straight from HBM, f32 accumulation,
    # contracting the lane dim of both operands (no explicit transpose).
    s = lax.dot_general(q_ref[...], x_ref[...],
                        (((1,), (1,)), ((), ())),
                        preferred_element_type=jnp.float32)   # (q_tile, db_tile)

    if dist_type == "l2":
        # -||q - x||^2 / m with the per-query ||q||^2 term dropped: it is
        # constant along the softmax axis and cancels exactly in the
        # normalization.  Pad columns are removed by the additive mask.
        logits = (2.0 * s - xn_ref[...]) * inv_m + mask_ref[...]
    else:
        logits = s * inv_m + mask_ref[...]

    m_prev = m_sc[...]
    m_new = jnp.maximum(m_prev, jnp.max(logits, axis=-1, keepdims=True))
    alpha = jnp.exp(m_prev - m_new)
    p = jnp.exp(logits - m_new)                                # unnormalized weights
    l_sc[...] = alpha * l_sc[...] + jnp.sum(p, axis=-1, keepdims=True)
    acc_sc[...] = alpha * acc_sc[...] + jnp.dot(
        p, c_ref[...], preferred_element_type=jnp.float32)     # (q_tile, C)
    m_sc[...] = m_new

    @pl.when(k == pl.num_programs(2) - 1)
    def _():
        # Emit per-split online-softmax partials; the tiny normalization /
        # cross-split combine happens once outside the kernel.
        acc_out[...] = acc_sc[...]
        m_out[...] = m_sc[...]
        l_out[...] = l_sc[...]


def attend_kde(q_feat, db_feat, coords, *, n_db, m, dist_type,
               q_tile_max=Q_TILE_MAX, db_tile_max=DB_TILE_MAX):
    assert dist_type in ("l2", "dot"), dist_type
    nq, d = q_feat.shape
    c = coords.shape[1]

    # Adaptive query tile: no 16x padded work for tiny batches, large tiles
    # (fewer db re-reads) for big ones.
    q_tile = q_tile_max if nq >= q_tile_max else max(8, _round_up(nq, 8))
    qp = _pad_rows_to(q_feat, _round_up(nq, q_tile))
    nq_pad = qp.shape[0]
    nq_tiles = nq_pad // q_tile

    # Large db tiles (256-multiples) so each reduction step amortizes the
    # per-grid-step overhead and fills the 256x256 MXU on v6e/v7x.
    db_tile = db_tile_max if n_db >= db_tile_max else _round_up(n_db, 256)
    kd_total = -(-n_db // db_tile)
    # If there is only one query tile, split the db reduction in two so the
    # second TensorCore (v7x) has work; partials are combined below.
    n_splits = 2 if (nq_tiles == 1 and kd_total >= 2) else 1
    ndb_pad = _round_up(n_db, db_tile * n_splits)
    kd = ndb_pad // (db_tile * n_splits)

    db = _pad_rows_to(db_feat, ndb_pad)
    cp = _pad_rows_to(coords.astype(jnp.float32), ndb_pad)
    # Precomputed additive pad mask (0 / -1e30), lane-dense, streamed per block.
    mask_row = jnp.where(jnp.arange(ndb_pad) < n_db, 0.0,
                         _MASK_VALUE).astype(jnp.float32)[None, :]

    inputs = [qp, db]
    in_specs = [
        pl.BlockSpec((q_tile, d), lambda s, i, k: (i, 0)),
        pl.BlockSpec((db_tile, d), lambda s, i, k: (s * kd + k, 0)),
    ]
    if dist_type == "l2":
        # db squared norms, hoisted out of the reduction loop; lane-dense row.
        # (Query norms are not needed: they cancel in the softmax.)
        xn_row = jnp.sum(jnp.square(db.astype(jnp.float32)), axis=-1)[None, :]
        inputs.append(xn_row)
        in_specs.append(pl.BlockSpec((1, db_tile),
                                     lambda s, i, k: (0, s * kd + k)))
    inputs += [mask_row, cp]
    in_specs += [
        pl.BlockSpec((1, db_tile), lambda s, i, k: (0, s * kd + k)),
        pl.BlockSpec((db_tile, c), lambda s, i, k: (s * kd + k, 0)),
    ]

    out_shape = (
        jax.ShapeDtypeStruct((n_splits * nq_pad, c), jnp.float32),  # coord acc
        jax.ShapeDtypeStruct((n_splits * nq_pad, 1), jnp.float32),  # running max
        jax.ShapeDtypeStruct((n_splits * nq_pad, 1), jnp.float32),  # denominator
    )
    out_specs = (
        pl.BlockSpec((q_tile, c), lambda s, i, k: (s * nq_tiles + i, 0)),
        pl.BlockSpec((q_tile, 1), lambda s, i, k: (s * nq_tiles + i, 0)),
        pl.BlockSpec((q_tile, 1), lambda s, i, k: (s * nq_tiles + i, 0)),
    )

    kernel = functools.partial(_attend_kernel, inv_m=1.0 / float(m),
                               dist_type=dist_type)
    acc_p, m_p, l_p = pl.pallas_call(
        kernel,
        out_shape=out_shape,
        grid_spec=pltpu.PrefetchScalarGridSpec(
            num_scalar_prefetch=0,
            grid=(n_splits, nq_tiles, kd),
            in_specs=in_specs,
            out_specs=out_specs,
            scratch_shapes=[
                pltpu.VMEM((q_tile, 1), jnp.float32),   # running max
                pltpu.VMEM((q_tile, 1), jnp.float32),   # running denominator
                pltpu.VMEM((q_tile, c), jnp.float32),   # coord accumulator
            ],
        ),
        compiler_params=pltpu.CompilerParams(
            dimension_semantics=("parallel", "parallel", "arbitrary"),
            vmem_limit_bytes=_VMEM_LIMIT_BYTES),
    )(*inputs)

    # Combine the per-split online-softmax partials (tiny; plain XLA).
    acc_p = acc_p.reshape(n_splits, nq_pad, c)
    m_p = m_p.reshape(n_splits, nq_pad, 1)
    l_p = l_p.reshape(n_splits, nq_pad, 1)
    m_g = jnp.max(m_p, axis=0)
    scale = jnp.exp(m_p - m_g[None])
    l_g = jnp.sum(l_p * scale, axis=0)
    acc_g = jnp.sum(acc_p * scale, axis=0)
    return (acc_g / l_g)[:nq]


# ---------------------------------- Network -------------------------------- #
class Network:
    """Pallas port of Network: features -> Descriptors2Weights -> KDE."""

    def __init__(self, feature_params, *, m, dist_type, transform_only=True):
        self.feature_params = feature_params
        self.m = m
        self.dist_type = dist_type
        self.transform_only = transform_only

    def __call__(self, *inputs):
        n_db = inputs[0].shape[0]
        db_feat = features_forward(inputs[0], self.feature_params)
        if self.transform_only:
            return db_feat[:n_db].astype(jnp.float32)

        q_x = inputs[1]
        q_feat = features_forward(q_x, self.feature_params)[:q_x.shape[0]]
        # TODO(synk): Descriptors2Weights / KDE bodies are not in the provided
        # source; implemented as softmax(-dist/m) weights + weighted coords.
        return attend_kde(q_feat, db_feat, inputs[2],
                          n_db=n_db, m=self.m, dist_type=self.dist_type)


# -------------------------------- reference -------------------------------- #
def _reference(db_x, q_x, coords, params, m, dist_type):
    w1, b1, w2, b2 = params
    r = lambda a: a.astype(jnp.bfloat16).astype(jnp.float32)   # mirror bf16 path

    def feats(x):
        h = jnp.maximum(r(x) @ r(w1) + b1, 0.0)
        return r(r(h) @ r(w2) + b2)        # kernel stores features in bf16

    d = feats(db_x)
    q = feats(q_x)
    s = q @ d.T
    if dist_type == "l2":
        dist = (jnp.sum(q * q, -1, keepdims=True)
                + jnp.sum(d * d, -1)[None, :] - 2.0 * s)
        logits = -dist / m
    else:
        logits = s / m
    logits = logits - jnp.max(logits, -1, keepdims=True)
    w = jnp.exp(logits)
    w = w / jnp.sum(w, -1, keepdims=True)
    return w @ coords


if __name__ == "__main__":
    D_IN, D_HID, D_OUT, C = 64, 128, 128, 2
    M = 4.0

    key = jax.random.PRNGKey(0)
    k1, k2, k3, k4, k5 = jax.random.split(key, 5)
    params = (
        0.05 * jax.random.normal(k1, (D_IN, D_HID), jnp.float32),
        0.01 * jax.random.normal(k2, (1, D_HID), jnp.float32),
        0.05 * jax.random.normal(k3, (D_HID, D_OUT), jnp.float32),
        0.01 * jax.random.normal(k4, (1, D_OUT), jnp.float32),
    )

    # Config A exercises single-tile + pad-mask; config B exercises the split
    # db reduction (two parallel partials + combine) and multi-step reduction.
    configs = [(500, 8), (1100, 20)]
    for n_db, n_q in configs:
        kd_, kq_, kc_ = jax.random.split(jax.random.fold_in(key, n_db), 3)
        db_descriptors = jax.random.normal(kd_, (n_db, D_IN), jnp.float32)
        query_descriptors = jax.random.normal(kq_, (n_q, D_IN), jnp.float32)
        db_coords = jax.random.uniform(kc_, (n_db, C), jnp.float32,
                                       minval=-90.0, maxval=90.0)
        for dist in ("l2", "dot"):
            net = Network(params, m=M, dist_type=dist, transform_only=False)
            out = jax.block_until_ready(
                net(db_descriptors, query_descriptors, db_coords))
            ref = _reference(db_descriptors, query_descriptors, db_coords,
                             params, M, dist)
            assert out.shape == (n_q, C), out.shape
            err = float(jnp.max(jnp.abs(out - ref)))
            assert jnp.allclose(out, ref, rtol=2e-3, atol=2e-3), (
                f"mismatch vs reference (dist={dist}, n_db={n_db}): {err}")

    # transform_only path returns the transformed db descriptors.
    db_descriptors = jax.random.normal(k5, (500, D_IN), jnp.float32)
    net_t = Network(params, m=M, dist_type="l2", transform_only=True)
    feats_out = jax.block_until_ready(net_t(db_descriptors))
    assert feats_out.shape == (500, D_OUT)

    print("KERNEL_OK")
</pallas_src>

<mosaic_0001>
module attributes {stable_mosaic.version = 11 : i64} {
  func.func @_features_kernel(%arg0: i32, %arg1: memref<504x64xf32, #tpu.memory_space<vmem>>, %arg2: memref<64x128xbf16, #tpu.memory_space<vmem>>, %arg3: memref<1x128xf32, #tpu.memory_space<vmem>>, %arg4: memref<128x128xbf16, #tpu.memory_space<vmem>>, %arg5: memref<1x128xf32, #tpu.memory_space<vmem>>, %arg6: memref<504x128xbf16, #tpu.memory_space<vmem>>) attributes {dimension_semantics = [#tpu.dimension_semantics<parallel>], iteration_bounds = array<i64: 1>, scalar_prefetch = 0 : i64, scratch_operands = 0 : i64, tpu.core_type = #tpu.core_type<tc>, window_params = [{transform_indices = @transform_0, window_bounds = array<i64: 504, 64>}, {pipeline_mode = #tpu.pipeline_mode<synchronous>, transform_indices = @transform_1, window_bounds = array<i64: 64, 128>}, {pipeline_mode = #tpu.pipeline_mode<synchronous>, transform_indices = @transform_2, window_bounds = array<i64: 1, 128>}, {pipeline_mode = #tpu.pipeline_mode<synchronous>, transform_indices = @transform_3, window_bounds = array<i64: 128, 128>}, {pipeline_mode = #tpu.pipeline_mode<synchronous>, transform_indices = @transform_4, window_bounds = array<i64: 1, 128>}, {transform_indices = @transform_5, window_bounds = array<i64: 504, 128>}]} {
    %c0 = arith.constant 0 : index
    %c0_0 = arith.constant 0 : index
    %0 = vector.load %arg1[%c0, %c0_0] : memref<504x64xf32, #tpu.memory_space<vmem>>, vector<504x64xf32>
    %1 = arith.truncf %0 : vector<504x64xf32> to vector<504x64xbf16>
    %c0_1 = arith.constant 0 : index
    %c0_2 = arith.constant 0 : index
    %2 = vector.load %arg2[%c0_1, %c0_2] : memref<64x128xbf16, #tpu.memory_space<vmem>>, vector<64x128xbf16>
    %cst = arith.constant dense<0.000000e+00> : vector<504x128xf32>
    %3 = tpu.matmul %1, %2, %cst {dimension_numbers = #tpu.dot_dimension_numbers<[1], [0], [0], [1], [0, 0, 1, 1], [], []>} : vector<504x64xbf16>, vector<64x128xbf16>, vector<504x128xf32> -> vector<504x128xf32>
    %c0_3 = arith.constant 0 : index
    %c0_4 = arith.constant 0 : index
    %4 = vector.load %arg3[%c0_3, %c0_4] : memref<1x128xf32, #tpu.memory_space<vmem>>, vector<1x128xf32>
    %5 = vector.broadcast %4 : vector<1x128xf32> to vector<504x128xf32>
    %6 = arith.addf %3, %5 : vector<504x128xf32>
    %cst_5 = arith.constant 0.000000e+00 : f32
    %7 = vector.broadcast %cst_5 : f32 to vector<504x128xf32>
    %8 = arith.maximumf %6, %7 : vector<504x128xf32>
    %9 = arith.truncf %8 : vector<504x128xf32> to vector<504x128xbf16>
    %c0_6 = arith.constant 0 : index
    %c0_7 = arith.constant 0 : index
    %10 = vector.load %arg4[%c0_6, %c0_7] : memref<128x128xbf16, #tpu.memory_space<vmem>>, vector<128x128xbf16>
    %cst_8 = arith.constant dense<0.000000e+00> : vector<504x128xf32>
    %11 = tpu.matmul %9, %10, %cst_8 {dimension_numbers = #tpu.dot_dimension_numbers<[1], [0], [0], [1], [0, 0, 1, 1], [], []>} : vector<504x128xbf16>, vector<128x128xbf16>, vector<504x128xf32> -> vector<504x128xf32>
    %c0_9 = arith.constant 0 : index
    %c0_10 = arith.constant 0 : index
    %12 = vector.load %arg5[%c0_9, %c0_10] : memref<1x128xf32, #tpu.memory_space<vmem>>, vector<1x128xf32>
    %13 = vector.broadcast %12 : vector<1x128xf32> to vector<504x128xf32>
    %14 = arith.addf %11, %13 : vector<504x128xf32>
    %15 = arith.truncf %14 : vector<504x128xf32> to vector<504x128xbf16>
    %c0_11 = arith.constant 0 : index
    %c0_12 = arith.constant 0 : index
    %16 = vector.load %arg6[%c0_11, %c0_12] : memref<504x128xbf16, #tpu.memory_space<vmem>>, vector<504x128xbf16>
    tpu.vector_store %arg6[%c0_11, %c0_12], %15 {strides = array<i32>} : memref<504x128xbf16, #tpu.memory_space<vmem>>, vector<504x128xbf16>,
    return
  }
  func.func @transform_0(%arg0: i32) -> (i32, i32) {
    %c0_i32 = arith.constant 0 : i32
    %c0_i32_0 = arith.constant 0 : i32
    return %arg0, %c0_i32 : i32, i32
  }
  func.func @transform_1(%arg0: i32) -> (i32, i32) {
    %c0_i32 = arith.constant 0 : i32
    %c0_i32_0 = arith.constant 0 : i32
    %c0_i32_1 = arith.constant 0 : i32
    return %c0_i32, %c0_i32_0 : i32, i32
  }
  func.func @transform_2(%arg0: i32) -> (i32, i32) {
    %c0_i32 = arith.constant 0 : i32
    %c0_i32_0 = arith.constant 0 : i32
    %c0_i32_1 = arith.constant 0 : i32
    return %c0_i32, %c0_i32_0 : i32, i32
  }
  func.func @transform_3(%arg0: i32) -> (i32, i32) {
    %c0_i32 = arith.constant 0 : i32
    %c0_i32_0 = arith.constant 0 : i32
    %c0_i32_1 = arith.constant 0 : i32
    return %c0_i32, %c0_i32_0 : i32, i32
  }
  func.func @transform_4(%arg0: i32) -> (i32, i32) {
    %c0_i32 = arith.constant 0 : i32
    %c0_i32_0 = arith.constant 0 : i32
    %c0_i32_1 = arith.constant 0 : i32
    return %c0_i32, %c0_i32_0 : i32, i32
  }
  func.func @transform_5(%arg0: i32) -> (i32, i32) {
    %c0_i32 = arith.constant 0 : i32
    %c0_i32_0 = arith.constant 0 : i32
    return %arg0, %c0_i32 : i32, i32
  }
}

</mosaic_0001>

<bundles_post_ra>
// kernel: tpu_custom_call.1
= control target key start
LH: loop header
LB: loop body
LE: loop exit
PB: predicated region body
PF: predicated region fallthrough
CT: control target
= control target key end

     0   :  { %s1642_s0 = inlined_call_operand.vmem [shape: f32[504,64], index: 0, kind: input, shape index: {}]   ;;  %s1643_s1 = inlined_call_operand.vmem [shape: bf16[64,128], index: 1, kind: input, shape index: {}]   ;;  %s1644_s2 = inlined_call_operand.vmem [shape: f32[1,128], index: 2, kind: input, shape index: {}]   ;;  %s1645_s3 = inlined_call_operand.vmem [shape: bf16[128,128], index: 3, kind: input, shape index: {}]   ;;  %s1646_s4 = inlined_call_operand.vmem [shape: f32[1,128], index: 4, kind: input, shape index: {}]   ;;  %s1647_s5 = inlined_call_operand.hbm [shape: bf16[504,128], index: 5, kind: output, shape index: {}]  }
   0x1   :  { %v976_v0 = vld [vmem:[%s1643_s1 + $0x18] sm:$0xff]  ;;  %v975_v1 = vld [vmem:[%s1643_s1 + $0x10] sm:$0xff] }
   0x2   :  { %254 = vmatpush.bf16.msra.mxu0 %v976_v0  ;;  %1170 = vmatpush.bf16.msra.mxu3 %v976_v0 }
   0x3   :  { %10 = vsyncpa [#allocation3], 0  ;;  %v974_v2 = vld [vmem:[%s1643_s1 + $0x8] sm:$0xff]  ;;  %v973_v3 = vld [vmem:[%s1643_s1] sm:$0xff]  ;;  %vm153_vm0 = vcmask 523264   ;;  %s881_s9 = sshll.u32 %s1647_s5, 4  ;;  %s882_s9 = int_to_ptr.hbm [resolvable:$true] %s881_s9 }
   0x4   :  { %v22_v4 = vld [vmem:[%s1642_s0] sm:$0xff]  ;;  %v23_v5 = vld [vmem:[%s1642_s0 + $0x8] sm:$0xff]  ;;  %v24_v7 = vld [vmem:[%s1642_s0 + $0x10] sm:$0xff]  ;;  %s1214_s10 = smov 64   ;;  %s1215_s11 = smov 4  }
   0x5   :  { %v85_v6 = vpack.c.bf16 %v23_v5, %v22_v4  ;;  %v25_v8 = vld [vmem:[%s1642_s0 + $0x18] sm:$0xff]  ;;  %v26_v10 = vld [vmem:[%s1642_s0 + $0x20] sm:$0xff]  ;;  %v27_v11 = vld [vmem:[%s1642_s0 + $0x28] sm:$0xff] }
   0x6   :  { %255 = vmatpush.bf16.msra.mxu0 %v975_v1  ;;  %1171 = vmatpush.bf16.msra.mxu3 %v975_v1  ;;  %v86_v9 = vpack.c.bf16 %v25_v8, %v24_v7  ;;  %v87_v12 = vpack.c.bf16 %v27_v11, %v26_v10  ;;  %v28_v13 = vld [vmem:[%s1642_s0 + $0x30] sm:$0xff]  ;;  %v29_v14 = vld [vmem:[%s1642_s0 + $0x38] sm:$0xff]  ;;  %v30_v16 = vld [vmem:[%s1642_s0 + $0x40] sm:$0xff] }
   0x7   :  { %v88_v15 = vpack.c.bf16 %v29_v14, %v28_v13  ;;  %v31_v17 = vld [vmem:[%s1642_s0 + $0x48] sm:$0xff]  ;;  %v984_v19 = vld [vmem:[%s1645_s3 + $0x38] sm:$0xff]  ;;  %v32_v20 = vld [vmem:[%s1642_s0 + $0x50] sm:$0xff] }
   0x8   :  { %v89_v18 = vpack.c.bf16 %v31_v17, %v30_v16  ;;  %581 = vmatpush.bf16.msra.mxu1 %v984_v19  ;;  %1174 = vmatpush.bf16.msra.mxu2 %v984_v19  ;;  %v33_v21 = vld [vmem:[%s1642_s0 + $0x58] sm:$0xff]  ;;  %v983_v23 = vld [vmem:[%s1645_s3 + $0x30] sm:$0xff]  ;;  %v982_v24 = vld [vmem:[%s1645_s3 + $0x28] sm:$0xff] }
   0x9   :  { %v90_v22 = vpack.c.bf16 %v33_v21, %v32_v20  ;;  %v981_v25 = vld [vmem:[%s1645_s3 + $0x20] sm:$0xff]  ;;  %v35_v27 = vld [vmem:[%s1642_s0 + $0x68] sm:$0xff]  ;;  %v980_v28 = vld [vmem:[%s1645_s3 + $0x18] sm:$0xff] }
   0xa   :  { %256 = vmatpush.bf16.msra.mxu0 %v974_v2  ;;  %1172 = vmatpush.bf16.msra.mxu3 %v974_v2  ;;  %v34_v26 = vld [vmem:[%s1642_s0 + $0x60] sm:$0xff]  ;;  %v979_v30 = vld [vmem:[%s1645_s3 + $0x10] sm:$0xff]  ;;  %v978_v31 = vld [vmem:[%s1645_s3 + $0x8] sm:$0xff] }
   0xb   :  { %v91_v29 = vpack.c.bf16 %v35_v27, %v34_v26  ;;  %v977_v32 = vld [vmem:[%s1645_s3] sm:$0xff]  ;;  %v36_v33 = vld [vmem:[%s1642_s0 + $0x70] sm:$0xff]  ;;  %v37_v34 = vld [vmem:[%s1642_s0 + $0x78] sm:$0xff] }
   0xc   :  { %582 = vmatpush.bf16.msra.mxu1 %v983_v23  ;;  %1175 = vmatpush.bf16.msra.mxu2 %v983_v23  ;;  %v92_v35 = vpack.c.bf16 %v37_v34, %v36_v33  ;;  %v38_v36 = vld [vmem:[%s1642_s0 + $0x80] sm:$0xff]  ;;  %v39_v37 = vld [vmem:[%s1642_s0 + $0x88] sm:$0xff]  ;;  %v40_v46 = vld [vmem:[%s1642_s0 + $0x90] sm:$0xff] }
   0xd   :  { %v93_v38 = vpack.c.bf16 %v39_v37, %v38_v36  ;;  %v1347_v40 = vld [vmem:[%s1644_s2] ss:$0 sm:$0xff]  ;;  %v41_v47 = vld [vmem:[%s1642_s0 + $0x98] sm:$0xff]  ;;  %v43_v57 = vld [vmem:[%s1642_s0 + $0xa8] sm:$0xff] }
   0xe   :  { %257 = vmatpush.bf16.msra.mxu0 %v973_v3  ;;  %1173 = vmatpush.bf16.msra.mxu3 %v973_v3  ;;  %v94_v49 = vpack.c.bf16 %v41_v47, %v40_v46  ;;  %v42_v56 = vld [vmem:[%s1642_s0 + $0xa0] sm:$0xff]  ;;  %v44_v2 = vld [vmem:[%s1642_s0 + $0xb0] sm:$0xff]  ;;  %v45_v3 = vld [vmem:[%s1642_s0 + $0xb8] sm:$0xff] }
   0xf   :  { %v95_v59 = vpack.c.bf16 %v43_v57, %v42_v56  ;;  %v96_v5 = vpack.c.bf16 %v45_v3, %v44_v2  ;;  %v47_v13 = vld [vmem:[%s1642_s0 + $0xc8] sm:$0xff]  ;;  %v49_v23 = vld [vmem:[%s1642_s0 + $0xd8] sm:$0xff]  ;;  %v56_v37 = vld [vmem:[%s1642_s0 + $0x110] sm:$0xff] }
  0x10   :  { %583 = vmatpush.bf16.msra.mxu1 %v982_v24  ;;  %1176 = vmatpush.bf16.msra.mxu2 %v982_v24  ;;  %v51_v33 = vld [vmem:[%s1642_s0 + $0xe8] sm:$0xff]  ;;  %v52_v46 = vld [vmem:[%s1642_s0 + $0xf0] sm:$0xff]  ;;  %v53_v47 = vld [vmem:[%s1642_s0 + $0xf8] sm:$0xff] }
  0x11   :  { %909 = vmatmul.msk.bf16.vlgmr.msra.gmra.mxu0 %vm153_vm0, %v85_v6 }
  0x14   :  { %584 = vmatpush.bf16.msra.mxu1 %v981_v25  ;;  %1177 = vmatpush.bf16.msra.mxu2 %v981_v25 }
  0x18   :  { %585 = vmatpush.bf16.msra.mxu1 %v980_v28  ;;  %1178 = vmatpush.bf16.msra.mxu2 %v980_v28 }
  0x1c   :  { %586 = vmatpush.bf16.msra.mxu1 %v979_v30  ;;  %1179 = vmatpush.bf16.msra.mxu2 %v979_v30 }
  0x20   :  { %587 = vmatpush.bf16.msra.mxu1 %v978_v31  ;;  %1180 = vmatpush.bf16.msra.mxu2 %v978_v31 }
  0x21   :  { %910 = vmatmul.msk.bf16.gmra.mxu0 %vm153_vm0, %v86_v9 }
  0x24   :  { %588 = vmatpush.bf16.msra.mxu1 %v977_v32  ;;  %1181 = vmatpush.bf16.msra.mxu2 %v977_v32  ;;  %v50_v32 = vld [vmem:[%s1642_s0 + $0xe0] sm:$0xff] }
  0x31   :  { %911 = vmatmul.msk.bf16.gmra.mxu0 %vm153_vm0, %v87_v12  ;;  %v46_v12 = vld [vmem:[%s1642_s0 + $0xc0] sm:$0xff] }
  0x41   :  { %912 = vmatmul.msk.bf16.gmra.mxu0 %vm153_vm0, %v88_v15  ;;  %v97_v15 = vpack.c.bf16 %v47_v13, %v46_v12  ;;  %v62_v12 = vld [vmem:[%s1642_s0 + $0x140] sm:$0xff]  ;;  %v63_v13 = vld [vmem:[%s1642_s0 + $0x148] sm:$0xff] }
  0x51   :  { %913 = vmatmul.msk.bf16.gmra.mxu0 %vm153_vm0, %v89_v18 }
  0x61   :  { %914 = vmatmul.msk.bf16.gmra.mxu0 %vm153_vm0, %v90_v22  ;;  %v48_v22 = vld [vmem:[%s1642_s0 + $0xd0] sm:$0xff] }
  0x62   :  { %v98_v25 = vpack.c.bf16 %v49_v23, %v48_v22 }
  0x71   :  { %915 = vmatmul.msk.bf16.gmra.mxu0 %vm153_vm0, %v91_v29 }
  0x81   :  { %916 = vmatmul.msk.bf16.gmra.mxu0 %vm153_vm0, %v92_v35  ;;  %v99_v35 = vpack.c.bf16 %v51_v33, %v50_v32 }
  0x8e   :  { %v259_v39 = vpop.f32.mrf.mxu0 }
  0x8f   :  { %v260_v41 = vadd.f32 %v1347_v40, %v259_v39 }
  0x91   :  { %917 = vmatmul.msk.bf16.gmra.mxu0 %vm153_vm0, %v93_v38  ;;  %v418_v44 = vmax.f32 %v260_v41, 0.0  ;;  %v57_v38 = vld [vmem:[%s1642_s0 + $0x118] sm:$0xff] }
  0x92   :  { %v102_v39 = vpack.c.bf16 %v57_v38, %v56_v37 }
  0x94   :  { %926 = vmatmul.msk.bf16.vlgmr.msra.gmra.mxu3 %vm153_vm0, %v102_v39 }
  0x96   :  { %v261_v42 = vpop.f32.mrf.mxu0 }
  0x97   :  { %v262_v43 = vadd.f32 %v1347_v40, %v261_v42 }
  0x99   :  { %v419_v45 = vmax.f32 %v262_v43, 0.0 }
  0x9b   :  { %v481_v48 = vpack.c.bf16 %v419_v45, %v418_v44 }
  0x9d   :  { %589 = vmatmul.bf16.vlgmr.msra.gmra.mxu1 %v481_v48 }
  0x9e   :  { %v264_v50 = vpop.f32.mrf.mxu0 }
  0x9f   :  { %v265_v51 = vadd.f32 %v1347_v40, %v264_v50 }
  0xa1   :  { %918 = vmatmul.msk.bf16.gmra.mxu0 %vm153_vm0, %v94_v49  ;;  %v420_v54 = vmax.f32 %v265_v51, 0.0  ;;  %v100_v49 = vpack.c.bf16 %v53_v47, %v52_v46  ;;  %v58_v51 = vld [vmem:[%s1642_s0 + $0x120] sm:$0xff] }
  0xa6   :  { %v266_v52 = vpop.f32.mrf.mxu0 }
  0xa7   :  { %v267_v53 = vadd.f32 %v1347_v40, %v266_v52  ;;  %v59_v52 = vld [vmem:[%s1642_s0 + $0x128] sm:$0xff] }
  0xa9   :  { %v421_v55 = vmax.f32 %v267_v53, 0.0  ;;  %v103_v53 = vpack.c.bf16 %v59_v52, %v58_v51 }
  0xab   :  { %v482_v58 = vpack.c.bf16 %v421_v55, %v420_v54  ;;  %927 = vmatmul.msk.bf16.gmra.mxu3 %vm153_vm0, %v103_v53 }
  0xad   :  { %594 = vmatmul.bf16.gmra.mxu1 %v482_v58 }
  0xae   :  { %v269_v60 = vpop.f32.mrf.mxu0 }
  0xaf   :  { %v270_v61 = vadd.f32 %v1347_v40, %v269_v60  ;;  %v55_v60 = vld [vmem:[%s1642_s0 + $0x108] sm:$0xff] }
  0xb1   :  { %919 = vmatmul.msk.bf16.gmra.mxu0 %vm153_vm0, %v95_v59  ;;  %v422_v0 = vmax.f32 %v270_v61, 0.0  ;;  %v54_v59 = vld [vmem:[%s1642_s0 + $0x100] sm:$0xff] }
  0xb6   :  { %v271_v62 = vpop.f32.mrf.mxu0 }
  0xb7   :  { %v272_v63 = vadd.f32 %v1347_v40, %v271_v62  ;;  %v101_v62 = vpack.c.bf16 %v55_v60, %v54_v59  ;;  %v69_v59 = vld [vmem:[%s1642_s0 + $0x178] sm:$0xff] }
  0xb9   :  { %v423_v1 = vmax.f32 %v272_v63, 0.0 }
  0xbb   :  { %v483_v4 = vpack.c.bf16 %v423_v1, %v422_v0  ;;  %v60_v0 = vld [vmem:[%s1642_s0 + $0x130] sm:$0xff]  ;;  %v61_v1 = vld [vmem:[%s1642_s0 + $0x138] sm:$0xff] }
  0xbc   :  { %v104_v2 = vpack.c.bf16 %v61_v1, %v60_v0 }
  0xbd   :  { %599 = vmatmul.bf16.gmra.mxu1 %v483_v4 }
  0xbe   :  { %v274_v6 = vpop.f32.mrf.mxu0  ;;  %928 = vmatmul.msk.bf16.gmra.mxu3 %vm153_vm0, %v104_v2 }
  0xbf   :  { %v275_v7 = vadd.f32 %v1347_v40, %v274_v6 }
  0xc1   :  { %920 = vmatmul.msk.bf16.gmra.mxu0 %vm153_vm0, %v96_v5  ;;  %v424_v10 = vmax.f32 %v275_v7, 0.0 }
  0xc6   :  { %v276_v8 = vpop.f32.mrf.mxu0 }
  0xc7   :  { %v277_v9 = vadd.f32 %v1347_v40, %v276_v8 }
  0xc9   :  { %v425_v11 = vmax.f32 %v277_v9, 0.0 }
  0xcb   :  { %v484_v14 = vpack.c.bf16 %v425_v11, %v424_v10  ;;  %v1448_v11 = vld [vmem:[%s1646_s4] ss:$0 sm:$0xff] }
  0xcd   :  { %604 = vmatmul.bf16.gmra.mxu1 %v484_v14  ;;  %v105_v14 = vpack.c.bf16 %v63_v13, %v62_v12 }
  0xce   :  { %v279_v16 = vpop.f32.mrf.mxu0 }
  0xcf   :  { %v280_v17 = vadd.f32 %v1347_v40, %v279_v16  ;;  %929 = vmatmul.msk.bf16.gmra.mxu3 %vm153_vm0, %v105_v14 }
  0xd1   :  { %921 = vmatmul.msk.bf16.gmra.mxu0 %vm153_vm0, %v97_v15  ;;  %v426_v20 = vmax.f32 %v280_v17, 0.0 }
  0xd6   :  { %v281_v18 = vpop.f32.mrf.mxu0 }
  0xd7   :  { %v282_v19 = vadd.f32 %v1347_v40, %v281_v18 }
  0xd9   :  { %v427_v21 = vmax.f32 %v282_v19, 0.0 }
  0xdb   :  { %v485_v24 = vpack.c.bf16 %v427_v21, %v426_v20 }
  0xdd   :  { %609 = vmatmul.bf16.gmra.mxu1 %v485_v24 }
  0xde   :  { %v284_v26 = vpop.f32.mrf.mxu0 }
  0xdf   :  { %v285_v27 = vadd.f32 %v1347_v40, %v284_v26 }
  0xe1   :  { %922 = vmatmul.msk.bf16.gmra.mxu0 %vm153_vm0, %v98_v25  ;;  %v428_v30 = vmax.f32 %v285_v27, 0.0  ;;  %v64_v27 = vld [vmem:[%s1642_s0 + $0x150] sm:$0xff] }
  0xe6   :  { %v286_v28 = vpop.f32.mrf.mxu0 }
  0xe7   :  { %v287_v29 = vadd.f32 %v1347_v40, %v286_v28  ;;  %v65_v28 = vld [vmem:[%s1642_s0 + $0x158] sm:$0xff] }
  0xe9   :  { %v429_v31 = vmax.f32 %v287_v29, 0.0  ;;  %v106_v29 = vpack.c.bf16 %v65_v28, %v64_v27 }
  0xeb   :  { %v486_v34 = vpack.c.bf16 %v429_v31, %v428_v30  ;;  %930 = vmatmul.msk.bf16.gmra.mxu3 %vm153_vm0, %v106_v29 }
  0xed   :  { %614 = vmatmul.bf16.gmra.mxu1 %v486_v34 }
  0xee   :  { %v289_v36 = vpop.f32.mrf.mxu0 }
  0xef   :  { %v290_v41 = vadd.f32 %v1347_v40, %v289_v36 }
  0xf1   :  { %923 = vmatmul.msk.bf16.gmra.mxu0 %vm153_vm0, %v99_v35  ;;  %v430_v44 = vmax.f32 %v290_v41, 0.0 }
  0xf6   :  { %v291_v42 = vpop.f32.mrf.mxu0 }
  0xf7   :  { %v292_v43 = vadd.f32 %v1347_v40, %v291_v42 }
  0xf9   :  { %v431_v45 = vmax.f32 %v292_v43, 0.0  ;;  %v66_v43 = vld [vmem:[%s1642_s0 + $0x160] sm:$0xff] }
  0xfb   :  { %v487_v48 = vpack.c.bf16 %v431_v45, %v430_v44  ;;  %v67_v44 = vld [vmem:[%s1642_s0 + $0x168] sm:$0xff] }
  0xfc   :  { %v107_v45 = vpack.c.bf16 %v67_v44, %v66_v43  ;;  %v74_v43 = vld [vmem:[%s1642_s0 + $0x1a0] sm:$0xff]  ;;  %v75_v44 = vld [vmem:[%s1642_s0 + $0x1a8] sm:$0xff] }
  0xfd   :  { %619 = vmatmul.bf16.gmra.mxu1 %v487_v48 }
  0xfe   :  { %v294_v50 = vpop.f32.mrf.mxu0  ;;  %931 = vmatmul.msk.bf16.gmra.mxu3 %vm153_vm0, %v107_v45  ;;  %v111_v45 = vpack.c.bf16 %v75_v44, %v74_v43  ;;  %v82_v44 = vld [vmem:[%s1642_s0 + $0x1e0] sm:$0xff] }
  0xff   :  { %v295_v54 = vadd.f32 %v1347_v40, %v294_v50 }
 0x101   :  { %924 = vmatmul.msk.bf16.gmra.mxu0 %vm153_vm0, %v100_v49  ;;  %v432_v57 = vmax.f32 %v295_v54, 0.0 }
 0x106   :  { %v296_v55 = vpop.f32.mrf.mxu0 }
 0x107   :  { %v297_v56 = vadd.f32 %v1347_v40, %v296_v55 }
 0x109   :  { %v433_v58 = vmax.f32 %v297_v56, 0.0 }
 0x10b   :  { %v488_v61 = vpack.c.bf16 %v433_v58, %v432_v57  ;;  %v68_v58 = vld [vmem:[%s1642_s0 + $0x170] sm:$0xff] }
 0x10c   :  { %v108_v60 = vpack.c.bf16 %v69_v59, %v68_v58 }
 0x10d   :  { %624 = vmatmul.bf16.gmra.mxu1 %v488_v61 }
 0x10e   :  { %v299_v63 = vpop.f32.mrf.mxu0  ;;  %932 = vmatmul.msk.bf16.gmra.mxu3 %vm153_vm0, %v108_v60  ;;  %v76_v60 = vld [vmem:[%s1642_s0 + $0x1b0] sm:$0xff] }
 0x10f   :  { %v300_v3 = vadd.f32 %v1347_v40, %v299_v63 }
 0x111   :  { %925 = vmatmul.msk.bf16.gmra.mxu0 %vm153_vm0, %v101_v62  ;;  %v434_v6 = vmax.f32 %v300_v3, 0.0 }
 0x116   :  { %v301_v4 = vpop.f32.mrf.mxu0 }
 0x117   :  { %v302_v5 = vadd.f32 %v1347_v40, %v301_v4 }
 0x119   :  { %v435_v7 = vmax.f32 %v302_v5, 0.0 }
 0x11a   :  { %v590_v8 = vpop.f32.mrf.mxu1 }
 0x11b   :  { %v489_v9 = vpack.c.bf16 %v435_v7, %v434_v6  ;;  %v591_v16 = vadd.f32 %v1448_v11, %v590_v8 }
 0x11d   :  { %629 = vmatmul.bf16.gmra.mxu1 %v489_v9  ;;  %v70_v9 = vld [vmem:[%s1642_s0 + $0x180] sm:$0xff] }
 0x11e   :  { %v304_v10 = vpop.f32.mrf.mxu0 }
 0x11f   :  { %v305_v18 = vadd.f32 %v1347_v40, %v304_v10  ;;  %v71_v10 = vld [vmem:[%s1642_s0 + $0x188] sm:$0xff] }
 0x120   :  { %v109_v12 = vpack.c.bf16 %v71_v10, %v70_v9 }
 0x121   :  { %v436_v22 = vmax.f32 %v305_v18, 0.0 }
 0x122   :  { %v592_v15 = vpop.f32.mrf.mxu1  ;;  %933 = vmatmul.msk.bf16.gmra.mxu3 %vm153_vm0, %v109_v12 }
 0x123   :  { %v593_v17 = vadd.f32 %v1448_v11, %v592_v15 }
 0x125   :  { %v988_v19 = vpack.c.bf16 %v593_v17, %v591_v16 }
 0x126   :  { %v306_v20 = vpop.f32.mrf.mxu0 }
 0x127   :  { %989 = vst [vmem:[#allocation2] sm:$0xff] %v988_v19   ;;  %v307_v21 = vadd.f32 %v1347_v40, %v306_v20 }
 0x129   :  { %v437_v23 = vmax.f32 %v307_v21, 0.0 }
 0x12a   :  { %v595_v24 = vpop.f32.mrf.mxu1 }
 0x12b   :  { %v490_v25 = vpack.c.bf16 %v437_v23, %v436_v22  ;;  %v596_v31 = vadd.f32 %v1448_v11, %v595_v24 }
 0x12d   :  { %634 = vmatmul.bf16.gmra.mxu1 %v490_v25  ;;  %v72_v25 = vld [vmem:[%s1642_s0 + $0x190] sm:$0xff] }
 0x12e   :  { %v309_v26 = vpop.f32.mrf.mxu0 }
 0x12f   :  { %v310_v33 = vadd.f32 %v1347_v40, %v309_v26  ;;  %v73_v26 = vld [vmem:[%s1642_s0 + $0x198] sm:$0xff] }
 0x130   :  { %v110_v27 = vpack.c.bf16 %v73_v26, %v72_v25 }
 0x131   :  { %v438_v37 = vmax.f32 %v310_v33, 0.0 }
 0x132   :  { %v597_v30 = vpop.f32.mrf.mxu1  ;;  %934 = vmatmul.msk.bf16.gmra.mxu3 %vm153_vm0, %v110_v27 }
 0x133   :  { %v598_v32 = vadd.f32 %v1448_v11, %v597_v30 }
 0x135   :  { %v993_v34 = vpack.c.bf16 %v598_v32, %v596_v31 }
 0x136   :  { %v311_v35 = vpop.f32.mrf.mxu0 }
 0x137   :  { %1140 = vst [vmem:[#allocation2 + $0x8] sm:$0xff] %v993_v34   ;;  %v312_v36 = vadd.f32 %v1347_v40, %v311_v35  ;;  %v344_v34 = vpop.f32.mrf.mxu3 }
 0x139   :  { %v439_v38 = vmax.f32 %v312_v36, 0.0 }
 0x13a   :  { %v600_v39 = vpop.f32.mrf.mxu1 }
 0x13b   :  { %v491_v41 = vpack.c.bf16 %v439_v38, %v438_v37  ;;  %v601_v47 = vadd.f32 %v1448_v11, %v600_v39 }
 0x13d   :  { %639 = vmatmul.bf16.gmra.mxu1 %v491_v41 }
 0x13e   :  { %v314_v42 = vpop.f32.mrf.mxu0 }
 0x13f   :  { %v315_v49 = vadd.f32 %v1347_v40, %v314_v42  ;;  %v346_v42 = vpop.f32.mrf.mxu3 }
 0x141   :  { %v440_v53 = vmax.f32 %v315_v49, 0.0 }
 0x142   :  { %v602_v46 = vpop.f32.mrf.mxu1  ;;  %935 = vmatmul.msk.bf16.gmra.mxu3 %vm153_vm0, %v111_v45  ;;  %v83_v45 = vld [vmem:[%s1642_s0 + $0x1e8] sm:$0xff] }
 0x143   :  { %v603_v48 = vadd.f32 %v1448_v11, %v602_v46 }
 0x145   :  { %v998_v50 = vpack.c.bf16 %v603_v48, %v601_v47 }
 0x146   :  { %v316_v51 = vpop.f32.mrf.mxu0 }
 0x147   :  { %1141 = vst [vmem:[#allocation2 + $0x10] sm:$0xff] %v998_v50   ;;  %v317_v52 = vadd.f32 %v1347_v40, %v316_v51 }
 0x149   :  { %v441_v54 = vmax.f32 %v317_v52, 0.0  ;;  %v349_v52 = vpop.f32.mrf.mxu3 }
 0x14a   :  { %v605_v55 = vpop.f32.mrf.mxu1 }
 0x14b   :  { %v492_v56 = vpack.c.bf16 %v441_v54, %v440_v53  ;;  %v606_v62 = vadd.f32 %v1448_v11, %v605_v55 }
 0x14d   :  { %644 = vmatmul.bf16.gmra.mxu1 %v492_v56 }
 0x14e   :  { %v319_v57 = vpop.f32.mrf.mxu0 }
 0x14f   :  { %v320_v0 = vadd.f32 %v1347_v40, %v319_v57 }
 0x151   :  { %v442_v4 = vmax.f32 %v320_v0, 0.0  ;;  %v351_v59 = vpop.f32.mrf.mxu3 }
 0x152   :  { %v607_v61 = vpop.f32.mrf.mxu1 }
 0x153   :  { %v608_v63 = vadd.f32 %v1448_v11, %v607_v61  ;;  %v77_v61 = vld [vmem:[%s1642_s0 + $0x1b8] sm:$0xff] }
 0x155   :  { %v1003_v1 = vpack.c.bf16 %v608_v63, %v606_v62  ;;  %v112_v62 = vpack.c.bf16 %v77_v61, %v76_v60 }
 0x156   :  { %v321_v2 = vpop.f32.mrf.mxu0 }
 0x157   :  { %1142 = vst [vmem:[#allocation2 + $0x18] sm:$0xff] %v1003_v1   ;;  %v322_v3 = vadd.f32 %v1347_v40, %v321_v2  ;;  %936 = vmatmul.msk.bf16.gmra.mxu3 %vm153_vm0, %v112_v62 }
 0x159   :  { %v443_v5 = vmax.f32 %v322_v3, 0.0 }
 0x15a   :  { %v610_v6 = vpop.f32.mrf.mxu1 }
 0x15b   :  { %v493_v7 = vpack.c.bf16 %v443_v5, %v442_v4  ;;  %v611_v14 = vadd.f32 %v1448_v11, %v610_v6  ;;  %v354_v5 = vpop.f32.mrf.mxu3 }
 0x15d   :  { %649 = vmatmul.bf16.gmra.mxu1 %v493_v7 }
 0x15e   :  { %v324_v8 = vpop.f32.mrf.mxu0 }
 0x15f   :  { %v325_v16 = vadd.f32 %v1347_v40, %v324_v8 }
 0x161   :  { %v444_v20 = vmax.f32 %v325_v16, 0.0 }
 0x162   :  { %v612_v13 = vpop.f32.mrf.mxu1 }
 0x163   :  { %v613_v15 = vadd.f32 %v1448_v11, %v612_v13  ;;  %v356_v12 = vpop.f32.mrf.mxu3  ;;  %v78_v13 = vld [vmem:[%s1642_s0 + $0x1c0] sm:$0xff] }
 0x165   :  { %v1008_v17 = vpack.c.bf16 %v613_v15, %v611_v14  ;;  %v79_v14 = vld [vmem:[%s1642_s0 + $0x1c8] sm:$0xff] }
 0x166   :  { %v326_v18 = vpop.f32.mrf.mxu0  ;;  %v113_v15 = vpack.c.bf16 %v79_v14, %v78_v13 }
 0x167   :  { %1143 = vst [vmem:[#allocation2 + $0x20] sm:$0xff] %v1008_v17   ;;  %v327_v19 = vadd.f32 %v1347_v40, %v326_v18  ;;  %v345_v17 = vadd.f32 %v1347_v40, %v344_v34  ;;  %v352_v34 = vadd.f32 %v1347_v40, %v351_v59 }
 0x168   :  { %937 = vmatmul.msk.bf16.gmra.mxu3 %vm153_vm0, %v113_v15 }
 0x169   :  { %v445_v21 = vmax.f32 %v327_v19, 0.0  ;;  %v347_v19 = vadd.f32 %v1347_v40, %v346_v42 }
 0x16a   :  { %v615_v22 = vpop.f32.mrf.mxu1 }
 0x16b   :  { %v494_v23 = vpack.c.bf16 %v445_v21, %v444_v20  ;;  %v616_v29 = vadd.f32 %v1448_v11, %v615_v22  ;;  %v359_v22 = vpop.f32.mrf.mxu3 }
 0x16c   :  { %v360_v60 = vadd.f32 %v1347_v40, %v359_v22 }
 0x16d   :  { %654 = vmatmul.bf16.gmra.mxu1 %v494_v23  ;;  %v452_v23 = vmax.f32 %v345_v17, 0.0 }
 0x16e   :  { %v329_v24 = vpop.f32.mrf.mxu0 }
 0x16f   :  { %v330_v31 = vadd.f32 %v1347_v40, %v329_v24  ;;  %v453_v24 = vmax.f32 %v347_v19, 0.0 }
 0x171   :  { %v446_v36 = vmax.f32 %v330_v31, 0.0  ;;  %v498_v26 = vpack.c.bf16 %v453_v24, %v452_v23 }
 0x172   :  { %v617_v28 = vpop.f32.mrf.mxu1 }
 0x173   :  { %v618_v30 = vadd.f32 %v1448_v11, %v617_v28  ;;  %v361_v27 = vpop.f32.mrf.mxu3  ;;  %v80_v28 = vld [vmem:[%s1642_s0 + $0x1d0] sm:$0xff] }
 0x174   :  { %v362_v62 = vadd.f32 %v1347_v40, %v361_v27 }
 0x175   :  { %v1013_v32 = vpack.c.bf16 %v618_v30, %v616_v29  ;;  %v81_v29 = vld [vmem:[%s1642_s0 + $0x1d8] sm:$0xff] }
 0x176   :  { %v331_v33 = vpop.f32.mrf.mxu0  ;;  %v114_v30 = vpack.c.bf16 %v81_v29, %v80_v28 }
 0x177   :  { %1144 = vst [vmem:[#allocation2 + $0x28] sm:$0xff] %v1013_v32   ;;  %v332_v35 = vadd.f32 %v1347_v40, %v331_v33  ;;  %v350_v32 = vadd.f32 %v1347_v40, %v349_v52 }
 0x178   :  { %938 = vmatmul.msk.bf16.gmra.mxu3 %vm153_vm0, %v114_v30 }
 0x179   :  { %v447_v37 = vmax.f32 %v332_v35, 0.0 }
 0x17a   :  { %v620_v38 = vpop.f32.mrf.mxu1 }
 0x17b   :  { %v495_v39 = vpack.c.bf16 %v447_v37, %v446_v36  ;;  %v621_v47 = vadd.f32 %v1448_v11, %v620_v38  ;;  %v364_v37 = vpop.f32.mrf.mxu3  ;;  %v454_v38 = vmax.f32 %v350_v32, 0.0 }
 0x17d   :  { %659 = vmatmul.bf16.gmra.mxu1 %v495_v39  ;;  %v455_v39 = vmax.f32 %v352_v34, 0.0 }
 0x17e   :  { %v334_v41 = vpop.f32.mrf.mxu0 }
 0x17f   :  { %v335_v49 = vadd.f32 %v1347_v40, %v334_v41  ;;  %v499_v42 = vpack.c.bf16 %v455_v39, %v454_v38 }
 0x181   :  { %v448_v54 = vmax.f32 %v335_v49, 0.0 }
 0x182   :  { %v622_v46 = vpop.f32.mrf.mxu1 }
 0x183   :  { %v623_v48 = vadd.f32 %v1448_v11, %v622_v46  ;;  %v366_v43 = vpop.f32.mrf.mxu3  ;;  %v115_v46 = vpack.c.bf16 %v83_v45, %v82_v44 }
 0x184   :  { %v367_v13 = vadd.f32 %v1347_v40, %v366_v43 }
 0x185   :  { %v1018_v50 = vpack.c.bf16 %v623_v48, %v621_v47  ;;  %v355_v48 = vadd.f32 %v1347_v40, %v354_v5 }
 0x186   :  { %v336_v51 = vpop.f32.mrf.mxu0 }
 0x187   :  { %1145 = vst [vmem:[#allocation2 + $0x30] sm:$0xff] %v1018_v50   ;;  %v337_v53 = vadd.f32 %v1347_v40, %v336_v51  ;;  %v357_v50 = vadd.f32 %v1347_v40, %v356_v12 }
 0x188   :  { %939 = vmatmul.msk.bf16.gmra.mxu3 %vm153_vm0, %v115_v46 }
 0x189   :  { %v449_v55 = vmax.f32 %v337_v53, 0.0 }
 0x18a   :  { %v625_v56 = vpop.f32.mrf.mxu1 }
 0x18b   :  { %v496_v57 = vpack.c.bf16 %v449_v55, %v448_v54  ;;  %v626_v0 = vadd.f32 %v1448_v11, %v625_v56  ;;  %v369_v53 = vpop.f32.mrf.mxu3  ;;  %v456_v54 = vmax.f32 %v355_v48, 0.0  ;;  %v457_v55 = vmax.f32 %v357_v50, 0.0 }
 0x18c   :  { %v370_v23 = vadd.f32 %v1347_v40, %v369_v53 }
 0x18d   :  { %664 = vmatmul.bf16.gmra.mxu1 %v496_v57  ;;  %v500_v57 = vpack.c.bf16 %v457_v55, %v456_v54 }
 0x18e   :  { %v339_v58 = vpop.f32.mrf.mxu0  ;;  %v462_v29 = vmax.f32 %v370_v23, 0.0 }
 0x18f   :  { %v340_v2 = vadd.f32 %v1347_v40, %v339_v58 }
 0x191   :  { %v450_v7 = vmax.f32 %v340_v2, 0.0  ;;  %v458_v2 = vmax.f32 %v360_v60, 0.0 }
 0x192   :  { %v627_v63 = vpop.f32.mrf.mxu1 }
 0x193   :  { %v628_v1 = vadd.f32 %v1448_v11, %v627_v63  ;;  %v371_v58 = vpop.f32.mrf.mxu3 }
 0x195   :  { %v1023_v3 = vpack.c.bf16 %v628_v1, %v626_v0 }
 0x196   :  { %v341_v4 = vpop.f32.mrf.mxu0 }
 0x197   :  { %1146 = vst [vmem:[#allocation2 + $0x38] sm:$0xff] %v1023_v3   ;;  %v342_v6 = vadd.f32 %v1347_v40, %v341_v4  ;;  %v459_v3 = vmax.f32 %v362_v62, 0.0  ;;  %v84_v4 = vld [vmem:[%s1642_s0 + $0x1f0] sm:$0xff]  ;;  %s1213_s0 = smov [#allocation2]  }
 0x198   :  { %v116_v5 = vpack.c.bf16 %v84_v4, %v84_v4  ;;  %s879_s1 = sshll.u32 %s1213_s0, 4  ;;  %s880_s1 = int_to_ptr.vmem [resolvable:$true] %s879_s1 }
 0x199   :  { %v451_v8 = vmax.f32 %v342_v6, 0.0 }
 0x19a   :  { %v630_v9 = vpop.f32.mrf.mxu1  ;;  %940 = vmatmul.msk.bf16.gmra.mxu3 %vm153_vm0, %v116_v5 }
 0x19b   :  { %v497_v10 = vpack.c.bf16 %v451_v8, %v450_v7  ;;  %v631_v18 = vadd.f32 %v1448_v11, %v630_v9  ;;  %v374_v1 = vpop.f32.mrf.mxu3  ;;  %v501_v7 = vpack.c.bf16 %v459_v3, %v458_v2 }
 0x19d   :  { %669 = vmatmul.bf16.vlgmr.msra.gmra.mxu2 %v497_v10  ;;  %v365_v10 = vadd.f32 %v1347_v40, %v364_v37 }
 0x19f   :  { %v460_v17 = vmax.f32 %v365_v10, 0.0 }
 0x1a2   :  { %v632_v16 = vpop.f32.mrf.mxu1 }
 0x1a3   :  { %v633_v20 = vadd.f32 %v1448_v11, %v632_v16  ;;  %v376_v8 = vpop.f32.mrf.mxu3 }
 0x1a4   :  { %v377_v37 = vadd.f32 %v1347_v40, %v376_v8 }
 0x1a5   :  { %v1028_v21 = vpack.c.bf16 %v633_v20, %v631_v18  ;;  %v461_v18 = vmax.f32 %v367_v13, 0.0 }
 0x1a6   :  { %v465_v43 = vmax.f32 %v377_v37, 0.0 }
 0x1a7   :  { %1147 = vst [vmem:[#allocation2 + $0x40] sm:$0xff] %v1028_v21   ;;  %v502_v20 = vpack.c.bf16 %v461_v18, %v460_v17 }
 0x1aa   :  { %v635_v25 = vpop.f32.mrf.mxu1 }
 0x1ab   :  { %v636_v33 = vadd.f32 %v1448_v11, %v635_v25  ;;  %v379_v16 = vpop.f32.mrf.mxu3  ;;  %v372_v25 = vadd.f32 %v1347_v40, %v371_v58 }
 0x1ac   :  { %v380_v48 = vadd.f32 %v1347_v40, %v379_v16 }
 0x1ad   :  { %674 = vmatmul.bf16.gmra.mxu2 %v498_v26  ;;  %v463_v30 = vmax.f32 %v372_v25, 0.0 }
 0x1ae   :  { %v466_v54 = vmax.f32 %v380_v48, 0.0 }
 0x1af   :  { %v503_v32 = vpack.c.bf16 %v463_v30, %v462_v29 }
 0x1b2   :  { %v637_v31 = vpop.f32.mrf.mxu1 }
 0x1b3   :  { %v638_v35 = vadd.f32 %v1448_v11, %v637_v31  ;;  %v381_v21 = vpop.f32.mrf.mxu3 }
 0x1b4   :  { %v382_v50 = vadd.f32 %v1347_v40, %v381_v21 }
 0x1b5   :  { %v1033_v36 = vpack.c.bf16 %v638_v35, %v636_v33  ;;  %v375_v35 = vadd.f32 %v1347_v40, %v374_v1 }
 0x1b6   :  { %v467_v55 = vmax.f32 %v382_v50, 0.0 }
 0x1b7   :  { %1148 = vst [vmem:[#allocation2 + $0x48] sm:$0xff] %v1033_v36  }
 0x1ba   :  { %v640_v41 = vpop.f32.mrf.mxu1 }
 0x1bb   :  { %v641_v49 = vadd.f32 %v1448_v11, %v640_v41  ;;  %v384_v28 = vpop.f32.mrf.mxu3 }
 0x1bd   :  { %679 = vmatmul.bf16.gmra.mxu2 %v499_v42  ;;  %v464_v42 = vmax.f32 %v375_v35, 0.0 }
 0x1bf   :  { %v504_v45 = vpack.c.bf16 %v465_v43, %v464_v42 }
 0x1c2   :  { %v642_v47 = vpop.f32.mrf.mxu1 }
 0x1c3   :  { %v643_v51 = vadd.f32 %v1448_v11, %v642_v47  ;;  %v386_v33 = vpop.f32.mrf.mxu3 }
 0x1c4   :  { %v387_v60 = vadd.f32 %v1347_v40, %v386_v33 }
 0x1c5   :  { %v1038_v52 = vpack.c.bf16 %v643_v51, %v641_v49 }
 0x1c7   :  { %1149 = vst [vmem:[#allocation2 + $0x50] sm:$0xff] %v1038_v52  }
 0x1ca   :  { %v645_v56 = vpop.f32.mrf.mxu1 }
 0x1cb   :  { %v646_v61 = vadd.f32 %v1448_v11, %v645_v56  ;;  %v389_v41 = vpop.f32.mrf.mxu3  ;;  %v505_v56 = vpack.c.bf16 %v467_v55, %v466_v54 }
 0x1cd   :  { %684 = vmatmul.bf16.gmra.mxu2 %v500_v57 }
 0x1d2   :  { %v647_v59 = vpop.f32.mrf.mxu1 }
 0x1d3   :  { %v648_v63 = vadd.f32 %v1448_v11, %v647_v59  ;;  %v391_v46 = vpop.f32.mrf.mxu3  ;;  %v385_v59 = vadd.f32 %v1347_v40, %v384_v28 }
 0x1d4   :  { %v392_v8 = vadd.f32 %v1347_v40, %v391_v46 }
 0x1d5   :  { %v1043_v0 = vpack.c.bf16 %v648_v63, %v646_v61  ;;  %v468_v62 = vmax.f32 %v385_v59, 0.0  ;;  %v469_v63 = vmax.f32 %v387_v60, 0.0 }
 0x1d6   :  { %v471_v10 = vmax.f32 %v392_v8, 0.0 }
 0x1d7   :  { %1150 = vst [vmem:[#allocation2 + $0x58] sm:$0xff] %v1043_v0   ;;  %v506_v4 = vpack.c.bf16 %v469_v63, %v468_v62 }
 0x1da   :  { %v650_v6 = vpop.f32.mrf.mxu1 }
 0x1db   :  { %v651_v12 = vadd.f32 %v1448_v11, %v650_v6  ;;  %v394_v53 = vpop.f32.mrf.mxu3 }
 0x1dd   :  { %689 = vmatmul.bf16.gmra.mxu2 %v501_v7  ;;  %v390_v7 = vadd.f32 %v1347_v40, %v389_v41 }
 0x1e2   :  { %v652_v9 = vpop.f32.mrf.mxu1 }
 0x1e3   :  { %v653_v14 = vadd.f32 %v1448_v11, %v652_v9  ;;  %v396_v57 = vpop.f32.mrf.mxu3  ;;  %v470_v9 = vmax.f32 %v390_v7, 0.0 }
 0x1e4   :  { %v397_v21 = vadd.f32 %v1347_v40, %v396_v57 }
 0x1e5   :  { %v1048_v15 = vpack.c.bf16 %v653_v14, %v651_v12  ;;  %v507_v17 = vpack.c.bf16 %v471_v10, %v470_v9 }
 0x1e6   :  { %v473_v23 = vmax.f32 %v397_v21, 0.0 }
 0x1e7   :  { %1151 = vst [vmem:[#allocation2 + $0x60] sm:$0xff] %v1048_v15  }
 0x1ea   :  { %v655_v19 = vpop.f32.mrf.mxu1 }
 0x1eb   :  { %v656_v24 = vadd.f32 %v1448_v11, %v655_v19  ;;  %v399_v61 = vpop.f32.mrf.mxu3 }
 0x1ed   :  { %694 = vmatmul.bf16.gmra.mxu2 %v502_v20  ;;  %v395_v20 = vadd.f32 %v1347_v40, %v394_v53 }
 0x1f2   :  { %v657_v22 = vpop.f32.mrf.mxu1 }
 0x1f3   :  { %v658_v26 = vadd.f32 %v1448_v11, %v657_v22  ;;  %v401_v5 = vpop.f32.mrf.mxu3  ;;  %v472_v22 = vmax.f32 %v395_v20, 0.0 }
 0x1f5   :  { %v1053_v27 = vpack.c.bf16 %v658_v26, %v656_v24  ;;  %v508_v28 = vpack.c.bf16 %v473_v23, %v472_v22 }
 0x1f7   :  { %1152 = vst [vmem:[#allocation2 + $0x68] sm:$0xff] %v1053_v27  }
 0x1fa   :  { %v660_v31 = vpop.f32.mrf.mxu1 }
 0x1fb   :  { %v661_v36 = vadd.f32 %v1448_v11, %v660_v31  ;;  %v404_v13 = vpop.f32.mrf.mxu3  ;;  %v400_v31 = vadd.f32 %v1347_v40, %v399_v61 }
 0x1fd   :  { %699 = vmatmul.bf16.gmra.mxu2 %v503_v32  ;;  %v402_v32 = vadd.f32 %v1347_v40, %v401_v5 }
 0x1ff   :  { %v475_v35 = vmax.f32 %v402_v32, 0.0 }
 0x202   :  { %v662_v34 = vpop.f32.mrf.mxu1 }
 0x203   :  { %v663_v38 = vadd.f32 %v1448_v11, %v662_v34  ;;  %v406_v19 = vpop.f32.mrf.mxu3  ;;  %v474_v34 = vmax.f32 %v400_v31, 0.0 }
 0x205   :  { %v1058_v39 = vpack.c.bf16 %v663_v38, %v661_v36 }
 0x207   :  { %1153 = vst [vmem:[#allocation2 + $0x70] sm:$0xff] %v1058_v39   ;;  %v509_v39 = vpack.c.bf16 %v475_v35, %v474_v34 }
 0x20a   :  { %v665_v44 = vpop.f32.mrf.mxu1 }
 0x20b   :  { %v666_v49 = vadd.f32 %v1448_v11, %v665_v44  ;;  %v409_v29 = vpop.f32.mrf.mxu3  ;;  %v405_v44 = vadd.f32 %v1347_v40, %v404_v13 }
 0x20c   :  { %v410_v55 = vadd.f32 %v1347_v40, %v409_v29 }
 0x20d   :  { %704 = vmatmul.bf16.gmra.mxu2 %v504_v45  ;;  %v407_v45 = vadd.f32 %v1347_v40, %v406_v19 }
 0x20e   :  { %v478_v57 = vmax.f32 %v410_v55, 0.0 }
 0x20f   :  { %v477_v48 = vmax.f32 %v407_v45, 0.0 }
 0x212   :  { %v667_v47 = vpop.f32.mrf.mxu1 }
 0x213   :  { %v668_v51 = vadd.f32 %v1448_v11, %v667_v47  ;;  %v411_v33 = vpop.f32.mrf.mxu3  ;;  %v476_v47 = vmax.f32 %v405_v44, 0.0 }
 0x215   :  { %v1063_v52 = vpack.c.bf16 %v668_v51, %v666_v49 }
 0x217   :  { %1154 = vst [vmem:[#allocation2 + $0x78] sm:$0xff] %v1063_v52   ;;  %v510_v52 = vpack.c.bf16 %v477_v48, %v476_v47 }
 0x21d   :  { %709 = vmatmul.bf16.gmra.mxu2 %v505_v56  ;;  %v414_v42 = vpop.f32.mrf.mxu3  ;;  %v412_v56 = vadd.f32 %v1347_v40, %v411_v33 }
 0x220   :  { %v670_v58 = vpop.f32.mrf.mxu2 }
 0x221   :  { %v671_v1 = vadd.f32 %v1448_v11, %v670_v58  ;;  %v479_v58 = vmax.f32 %v412_v56, 0.0 }
 0x223   :  { %v511_v62 = vpack.c.bf16 %v479_v58, %v478_v57 }
 0x225   :  { %v416_v46 = vpop.f32.mrf.mxu3 }
 0x228   :  { %v672_v0 = vpop.f32.mrf.mxu2 }
 0x229   :  { %v673_v2 = vadd.f32 %v1448_v11, %v672_v0 }
 0x22b   :  { %v1068_v3 = vpack.c.bf16 %v673_v2, %v671_v1  ;;  %v415_v1 = vadd.f32 %v1347_v40, %v414_v42 }
 0x22d   :  { %1155 = vst [vmem:[#allocation2 + $0x80] sm:$0xff] %v1068_v3   ;;  %714 = vmatmul.bf16.gmra.mxu2 %v506_v4  ;;  %v480_v2 = vmax.f32 %v415_v1, 0.0 }
 0x22f   :  { %v512_v4 = vpack.c.bf16 %v480_v2, %v480_v2 }
 0x230   :  { %v675_v6 = vpop.f32.mrf.mxu2 }
 0x231   :  { %v676_v14 = vadd.f32 %v1448_v11, %v675_v6 }
 0x238   :  { %v677_v12 = vpop.f32.mrf.mxu2 }
 0x239   :  { %v678_v15 = vadd.f32 %v1448_v11, %v677_v12 }
 0x23b   :  { %v1073_v16 = vpack.c.bf16 %v678_v15, %v676_v14 }
 0x23d   :  { %1156 = vst [vmem:[#allocation2 + $0x88] sm:$0xff] %v1073_v16   ;;  %719 = vmatmul.bf16.gmra.mxu2 %v507_v17 }
 0x240   :  { %v680_v18 = vpop.f32.mrf.mxu2 }
 0x241   :  { %v681_v25 = vadd.f32 %v1448_v11, %v680_v18 }
 0x248   :  { %v682_v24 = vpop.f32.mrf.mxu2 }
 0x249   :  { %v683_v26 = vadd.f32 %v1448_v11, %v682_v24 }
 0x24b   :  { %v1078_v27 = vpack.c.bf16 %v683_v26, %v681_v25 }
 0x24d   :  { %1157 = vst [vmem:[#allocation2 + $0x90] sm:$0xff] %v1078_v27   ;;  %724 = vmatmul.bf16.gmra.mxu2 %v508_v28 }
 0x250   :  { %v685_v30 = vpop.f32.mrf.mxu2 }
 0x251   :  { %v686_v37 = vadd.f32 %v1448_v11, %v685_v30 }
 0x258   :  { %v687_v36 = vpop.f32.mrf.mxu2 }
 0x259   :  { %v688_v38 = vadd.f32 %v1448_v11, %v687_v36 }
 0x25b   :  { %v1083_v41 = vpack.c.bf16 %v688_v38, %v686_v37 }
 0x25d   :  { %1158 = vst [vmem:[#allocation2 + $0x98] sm:$0xff] %v1083_v41   ;;  %729 = vmatmul.bf16.gmra.mxu2 %v509_v39 }
 0x260   :  { %v690_v43 = vpop.f32.mrf.mxu2 }
 0x261   :  { %v691_v50 = vadd.f32 %v1448_v11, %v690_v43 }
 0x268   :  { %v692_v49 = vpop.f32.mrf.mxu2 }
 0x269   :  { %v693_v51 = vadd.f32 %v1448_v11, %v692_v49 }
 0x26b   :  { %v1088_v53 = vpack.c.bf16 %v693_v51, %v691_v50 }
 0x26d   :  { %1159 = vst [vmem:[#allocation2 + $0xa0] sm:$0xff] %v1088_v53   ;;  %734 = vmatmul.bf16.gmra.mxu2 %v510_v52 }
 0x270   :  { %v695_v54 = vpop.f32.mrf.mxu2 }
 0x271   :  { %v696_v60 = vadd.f32 %v1448_v11, %v695_v54 }
 0x278   :  { %v697_v59 = vpop.f32.mrf.mxu2 }
 0x279   :  { %v698_v61 = vadd.f32 %v1448_v11, %v697_v59 }
 0x27b   :  { %v1093_v63 = vpack.c.bf16 %v698_v61, %v696_v60 }
 0x27d   :  { %1160 = vst [vmem:[#allocation2 + $0xa8] sm:$0xff] %v1093_v63   ;;  %739 = vmatmul.bf16.gmra.mxu2 %v511_v62 }
 0x280   :  { %v700_v0 = vpop.f32.mrf.mxu2 }
 0x281   :  { %v701_v5 = vadd.f32 %v1448_v11, %v700_v0 }
 0x288   :  { %v702_v3 = vpop.f32.mrf.mxu2 }
 0x289   :  { %v703_v6 = vadd.f32 %v1448_v11, %v702_v3 }
 0x28b   :  { %v1098_v7 = vpack.c.bf16 %v703_v6, %v701_v5 }
 0x28d   :  { %1161 = vst [vmem:[#allocation2 + $0xb0] sm:$0xff] %v1098_v7   ;;  %744 = vmatmul.bf16.gmra.mxu2 %v512_v4 }
 0x290   :  { %v705_v8 = vpop.f32.mrf.mxu2 }
 0x291   :  { %v706_v10 = vadd.f32 %v1448_v11, %v705_v8 }
 0x298   :  { %v707_v9 = vpop.f32.mrf.mxu2 }
 0x299   :  { %v708_v12 = vadd.f32 %v1448_v11, %v707_v9 }
 0x29b   :  { %v1103_v13 = vpack.c.bf16 %v708_v12, %v706_v10 }
 0x29d   :  { %1162 = vst [vmem:[#allocation2 + $0xb8] sm:$0xff] %v1103_v13  }
 0x2a0   :  { %v710_v14 = vpop.f32.mrf.mxu2 }
 0x2a1   :  { %v711_v15 = vadd.f32 %v1448_v11, %v710_v14 }
 0x2a8   :  { %v712_v40 = vpop.f32.mrf.mxu2 }
 0x2a9   :  { %v713_v16 = vadd.f32 %v1448_v11, %v712_v40 }
 0x2ab   :  { %v1108_v17 = vpack.c.bf16 %v713_v16, %v711_v15 }
 0x2ad   :  { %1163 = vst [vmem:[#allocation2 + $0xc0] sm:$0xff] %v1108_v17  }
 0x2b0   :  { %v715_v18 = vpop.f32.mrf.mxu2 }
 0x2b1   :  { %v716_v20 = vadd.f32 %v1448_v11, %v715_v18 }
 0x2b8   :  { %v717_v19 = vpop.f32.mrf.mxu2 }
 0x2b9   :  { %v718_v21 = vadd.f32 %v1448_v11, %v717_v19 }
 0x2bb   :  { %v1113_v22 = vpack.c.bf16 %v718_v21, %v716_v20 }
 0x2bd   :  { %1164 = vst [vmem:[#allocation2 + $0xc8] sm:$0xff] %v1113_v22  }
 0x2c0   :  { %v720_v23 = vpop.f32.mrf.mxu2 }
 0x2c1   :  { %v721_v25 = vadd.f32 %v1448_v11, %v720_v23 }
 0x2c8   :  { %v722_v24 = vpop.f32.mrf.mxu2 }
 0x2c9   :  { %v723_v26 = vadd.f32 %v1448_v11, %v722_v24 }
 0x2cb   :  { %v1118_v27 = vpack.c.bf16 %v723_v26, %v721_v25 }
 0x2cd   :  { %1165 = vst [vmem:[#allocation2 + $0xd0] sm:$0xff] %v1118_v27  }
 0x2d0   :  { %v725_v28 = vpop.f32.mrf.mxu2 }
 0x2d1   :  { %v726_v30 = vadd.f32 %v1448_v11, %v725_v28 }
 0x2d8   :  { %v727_v29 = vpop.f32.mrf.mxu2 }
 0x2d9   :  { %v728_v31 = vadd.f32 %v1448_v11, %v727_v29 }
 0x2db   :  { %v1123_v32 = vpack.c.bf16 %v728_v31, %v726_v30 }
 0x2dd   :  { %1166 = vst [vmem:[#allocation2 + $0xd8] sm:$0xff] %v1123_v32  }
 0x2e0   :  { %v730_v33 = vpop.f32.mrf.mxu2 }
 0x2e1   :  { %v731_v35 = vadd.f32 %v1448_v11, %v730_v33 }
 0x2e8   :  { %v732_v34 = vpop.f32.mrf.mxu2 }
 0x2e9   :  { %v733_v36 = vadd.f32 %v1448_v11, %v732_v34 }
 0x2eb   :  { %v1128_v37 = vpack.c.bf16 %v733_v36, %v731_v35 }
 0x2ed   :  { %1167 = vst [vmem:[#allocation2 + $0xe0] sm:$0xff] %v1128_v37  }
 0x2f0   :  { %v735_v38 = vpop.f32.mrf.mxu2 }
 0x2f1   :  { %v736_v41 = vadd.f32 %v1448_v11, %v735_v38 }
 0x2f8   :  { %v737_v39 = vpop.f32.mrf.mxu2 }
 0x2f9   :  { %v738_v42 = vadd.f32 %v1448_v11, %v737_v39 }
 0x2fb   :  { %v1133_v43 = vpack.c.bf16 %v738_v42, %v736_v41 }
 0x2fd   :  { %1168 = vst [vmem:[#allocation2 + $0xe8] sm:$0xff] %v1133_v43  }
 0x300   :  { %v740_v44 = vpop.f32.mrf.mxu2 }
 0x301   :  { %v741_v46 = vadd.f32 %v1448_v11, %v740_v44 }
 0x308   :  { %v742_v45 = vpop.f32.mrf.mxu2 }
 0x309   :  { %v743_v47 = vadd.f32 %v1448_v11, %v742_v45 }
 0x30b   :  { %v1138_v48 = vpack.c.bf16 %v743_v47, %v741_v46 }
 0x30d   :  { %1169 = vst [vmem:[#allocation2 + $0xf0] sm:$0xff] %v1138_v48  }
 0x310   :  { %v745_v49 = vpop.f32.mrf.mxu2 }
 0x311   :  { %v746_v50 = vadd.f32 %v1448_v11, %v745_v49 }
 0x313   :  { %v811_v51 = vpack.c.bf16 %v746_v50, %v746_v50 }
 0x315   :  { %874 = vst [vmem:[#allocation2 + $0xf8] sm:$0xf] %v811_v51 }
 0x316   :  { %887 = dma.vmem_to_hbm [thread:$0]  %s880_s1, 4032, %s882_s9, [#allocation3], %s1214_s10, %s1214_s10, %s1215_s11  }
 0x318   :  { %v747_v52 = vpop.f32.mrf.mxu2 }
 0x319   :  { %1211 = dma.done.wait [#allocation3], 4032  }
 0x31a   :  { %1212 = vsyncadd [#allocation3], 4294963264 }
 0x31b   :  { %892 = vsyncpa [#allocation3], 1 }

</bundles_post_ra>
